<compile_context>
chip_gen: v7x
topology: tpu7x:2x2x1
jax: 0.10.0
libtpu: 0.0.40
codegen_flags: <defaults>
</compile_context>

<pallas_src>
import functools

import jax
import jax.numpy as jnp
from jax.experimental import pallas as pl
from jax.experimental.pallas import tpu as pltpu


def patch_merging_kernel(x_ref, w_ref, g_ref, b_ref, o_ref, patches_ref,
                         *, wo, p, cin, bb, eps):
    cout = w_ref.shape[0]

    # Hoisted boundary mask in *source* coordinates: when a tap is shifted right by one
    # output column (dj == 0), the source's last column (j = wo-1) would wrap into the next
    # output row's j = 0 slot; it must read the conv zero padding instead.
    col = jax.lax.broadcasted_iota(jnp.int32, (cin, p), 1)
    not_right = (col % wo) != (wo - 1)

    # ---- im2col: write the 9 taps of every sample into the shared VMEM patch matrix ----
    for s in range(bb):
        xp = x_ref[s]                                            # (4*cin, p) bf16 phases
        ph = [xp[q * cin:(q + 1) * cin, :] for q in range(4)]    # q = a*2 + b
        ph_m = {a: jnp.where(not_right, ph[a * 2 + 1], jnp.zeros_like(ph[a * 2 + 1]))
                for a in (0, 1)}                                 # b=1 phases, right col zeroed
        base = s * p
        for di in range(3):
            a = 0 if di == 1 else 1
            for dj in range(3):
                b = 0 if dj == 1 else 1
                # -1 output-row shift iff di == 0, -1 output-col shift iff dj == 0.
                shift = (wo if di == 0 else 0) + (1 if dj == 0 else 0)
                src = ph_m[a] if dj == 0 else ph[a * 2 + b]
                rows = pl.ds((di * 3 + dj) * cin, cin)
                if shift:
                    patches_ref[rows, pl.ds(base, shift)] = (
                        jnp.zeros((cin, shift), patches_ref.dtype))
                    patches_ref[rows, pl.ds(base + shift, p - shift)] = src[:, :p - shift]
                else:
                    patches_ref[rows, pl.ds(base, p)] = src

    # ---- Conv2d(k=3, s=2, p=1): one lane-dense MXU matmul covering all bb samples -------
    conv = jnp.dot(w_ref[...], patches_ref[...],
                   preferred_element_type=jnp.float32)           # (cout, bb*p) f32

    # ---- GroupNorm(num_groups=1) per sample: 2 reduction passes + 1 scale/bias pass -----
    inv_n = 1.0 / float(cout * p)
    for s in range(bb):
        cs = conv[:, s * p:(s + 1) * p]                          # (cout, p)
        ssum = jnp.sum(jnp.sum(cs, axis=1, keepdims=True), axis=0, keepdims=True)
        ssq = jnp.sum(jnp.sum(cs * cs, axis=1, keepdims=True), axis=0, keepdims=True)
        mean = ssum * inv_n
        var = ssq * inv_n - mean * mean                          # biased, as PyTorch
        inv = jax.lax.rsqrt(var + eps)
        scale = g_ref[...] * inv                                 # (cout, 1)
        bias = b_ref[...] - mean * scale                         # (cout, 1)
        o_ref[s] = (cs * scale + bias).astype(o_ref.dtype)


def patch_merging(x, w, gamma, beta, *, eps=1e-5, block_batch=None):
    """x: (N, Cin, H, W) NCHW f32; w: (Cout, Cin, 3, 3) OIHW; gamma/beta: (Cout,)."""
    N, Cin, H, W = x.shape
    Cout = w.shape[0]
    assert H % 2 == 0 and W % 2 == 0, "PatchMerging expects even input resolution"
    Ho, Wo = H // 2, W // 2
    P = Ho * Wo

    # Samples per grid block: fold batch into the matmul lane axis while P is small so the
    # MXU N dimension stays >= ~128 lanes and per-step grid overhead is amortized.
    if block_batch is None:
        block_batch = max(1, min(N, 512 // max(P, 1)))
    bb = max(1, min(block_batch, N))
    while N % bb:
        bb -= 1

    # Wrapper-side layout plumbing (one fused XLA transpose+cast pass, bf16 output):
    #   phases[n, (a*2+b)*Cin + ci, i*Wo + j] = x[n, ci, 2*i + a, 2*j + b]
    xph = (x.astype(jnp.bfloat16)
             .reshape(N, Cin, Ho, 2, Wo, 2)
             .transpose(0, 3, 5, 1, 2, 4)
             .reshape(N, 4 * Cin, P))
    # Conv weight -> (Cout, 9*Cin), columns ordered (di, dj, ci) to match the kernel taps.
    wmat = w.transpose(0, 2, 3, 1).reshape(Cout, 9 * Cin).astype(jnp.bfloat16)
    g2 = gamma.reshape(Cout, 1).astype(jnp.float32)
    b2 = beta.reshape(Cout, 1).astype(jnp.float32)

    # Scoped-VMEM budget from the actual block footprint (keeps whole-image blocks legal on
    # v5e/v6e at big resolutions; v7x's 64 MiB cap is the spatial-tiling TODO instead).
    in_b = bb * 4 * Cin * P * 2
    out_b = bb * Cout * P * 4
    w_b = Cout * 9 * Cin * 2
    patch_b = 9 * Cin * bb * P * 2
    est = 2 * (in_b + out_b + w_b + 2 * Cout * 4) + patch_b + (2 << 20)
    vmem_limit = int(min(100 * 2 ** 20, max(32 * 2 ** 20, est)))

    kernel = functools.partial(patch_merging_kernel, wo=Wo, p=P, cin=Cin, bb=bb, eps=eps)
    out = pl.pallas_call(
        kernel,
        out_shape=jax.ShapeDtypeStruct((N, Cout, P), jnp.float32),
        grid_spec=pltpu.PrefetchScalarGridSpec(
            num_scalar_prefetch=0,
            grid=(N // bb,),
            in_specs=[
                pl.BlockSpec((bb, 4 * Cin, P), lambda g: (g, 0, 0)),   # bf16 phase planes
                pl.BlockSpec((Cout, 9 * Cin), lambda g: (0, 0)),       # conv weight (im2col form)
                pl.BlockSpec((Cout, 1), lambda g: (0, 0)),             # GroupNorm gamma
                pl.BlockSpec((Cout, 1), lambda g: (0, 0)),             # GroupNorm beta
            ],
            out_specs=pl.BlockSpec((bb, Cout, P), lambda g: (g, 0, 0)),
            scratch_shapes=[pltpu.VMEM((9 * Cin, bb * P), jnp.bfloat16)],
        ),
        compiler_params=pltpu.CompilerParams(
            dimension_semantics=("parallel",),
            vmem_limit_bytes=vmem_limit),
    )(xph, wmat, g2, b2)
    return out.reshape(N, Cout, Ho, Wo)


def ref_forward(x, w, gamma, beta, eps=1e-5):
    """Pure-JAX NCHW reference: Conv2d(k=3, s=2, p=1, bias=False) + GroupNorm(1, Cout)."""
    y = jax.lax.conv_general_dilated(
        x, w, window_strides=(2, 2), padding=((1, 1), (1, 1)),
        dimension_numbers=("NCHW", "OIHW", "NCHW"))
    mean = jnp.mean(y, axis=(1, 2, 3), keepdims=True)
    var = jnp.mean((y - mean) ** 2, axis=(1, 2, 3), keepdims=True)
    yn = (y - mean) * jax.lax.rsqrt(var + eps)
    return yn * gamma.reshape(1, -1, 1, 1) + beta.reshape(1, -1, 1, 1)


if __name__ == "__main__":
    key = jax.random.PRNGKey(0)
    N, Cin, H, W = 2, 4, 16, 16
    Cout = 8                                   # outdim (PatchMerging typically uses 2*dim)

    k1, k2, k3, k4 = jax.random.split(key, 4)
    x = jax.random.normal(k1, (N, Cin, H, W), jnp.float32)              # NCHW, as PyTorch
    w = 0.02 * jax.random.normal(k2, (Cout, Cin, 3, 3), jnp.float32)    # Conv2d weight, bias=False
    gamma = 1.0 + 0.1 * jax.random.normal(k3, (Cout,), jnp.float32)     # GroupNorm affine weight
    beta = 0.1 * jax.random.normal(k4, (Cout,), jnp.float32)            # GroupNorm affine bias

    out = jax.block_until_ready(patch_merging(x, w, gamma, beta))
    ref = ref_forward(x, w, gamma, beta)

    assert out.shape == (N, Cout, H // 2, W // 2), out.shape
    # Tolerance covers bf16 MXU operand rounding (f32 accumulation); f32 path would be ~1e-6.
    max_err = float(jnp.max(jnp.abs(out - ref)))
    assert jnp.allclose(out, ref, atol=3e-2, rtol=3e-2), f"max_err={max_err}"
    print("KERNEL_OK")
</pallas_src>

<mosaic_0001>
module attributes {stable_mosaic.version = 11 : i64} {
  func.func @patch_merging_kernel(%arg0: i32, %arg1: memref<2x16x64xbf16, #tpu.memory_space<vmem>>, %arg2: memref<8x36xbf16, #tpu.memory_space<vmem>>, %arg3: memref<8x1xf32, #tpu.memory_space<vmem>>, %arg4: memref<8x1xf32, #tpu.memory_space<vmem>>, %arg5: memref<2x8x64xf32, #tpu.memory_space<vmem>>, %arg6: memref<36x128xbf16, #tpu.memory_space<vmem>>) attributes {dimension_semantics = [#tpu.dimension_semantics<parallel>], iteration_bounds = array<i64: 1>, scalar_prefetch = 0 : i64, scratch_operands = 1 : i64, tpu.core_type = #tpu.core_type<tc>, window_params = [{transform_indices = @transform_0, window_bounds = array<i64: 2, 16, 64>}, {pipeline_mode = #tpu.pipeline_mode<synchronous>, transform_indices = @transform_1, window_bounds = array<i64: 8, 36>}, {pipeline_mode = #tpu.pipeline_mode<synchronous>, transform_indices = @transform_2, window_bounds = array<i64: 8, 1>}, {pipeline_mode = #tpu.pipeline_mode<synchronous>, transform_indices = @transform_3, window_bounds = array<i64: 8, 1>}, {transform_indices = @transform_4, window_bounds = array<i64: 2, 8, 64>}]} {
    %0 = tpu.iota {dimensions = array<i32: 1>} : vector<4x64xi32>
    %c8_i32 = arith.constant 8 : i32
    %c0_i32 = arith.constant 0 : i32
    %1 = arith.cmpi eq, %c8_i32, %c0_i32 : i32
    %c1_i32 = arith.constant 1 : i32
    %2 = arith.select %1, %c1_i32, %c8_i32 : i32
    %3 = vector.broadcast %2 : i32 to vector<4x64xi32>
    %4 = arith.remsi %0, %3 : vector<4x64xi32>
    %c0_i32_0 = arith.constant 0 : i32
    %5 = vector.broadcast %c0_i32_0 : i32 to vector<4x64xi32>
    %6 = arith.cmpi ne, %4, %5 : vector<4x64xi32>
    %c0_i32_1 = arith.constant 0 : i32
    %7 = vector.broadcast %c0_i32_1 : i32 to vector<4x64xi32>
    %8 = arith.cmpi slt, %4, %7 : vector<4x64xi32>
    %c0_i32_2 = arith.constant 0 : i32
    %9 = arith.cmpi slt, %2, %c0_i32_2 : i32
    %10 = vector.broadcast %9 : i1 to vector<4x64xi1>
    %11 = vector.broadcast %10 : vector<4x64xi1> to vector<4x64xi1>
    %12 = arith.xori %8, %11 : vector<4x64xi1>
    %13 = arith.andi %12, %6 : vector<4x64xi1>
    %14 = vector.broadcast %2 : i32 to vector<4x64xi32>
    %15 = arith.addi %4, %14 : vector<4x64xi32>
    %16 = arith.select %13, %15, %4 : vector<4x64xi1>, vector<4x64xi32>
    %c7_i32 = arith.constant 7 : i32
    %17 = vector.broadcast %c7_i32 : i32 to vector<4x64xi32>
    %18 = arith.cmpi ne, %16, %17 : vector<4x64xi32>
    %c0 = arith.constant 0 : index
    %c0_3 = arith.constant 0 : index
    %c0_4 = arith.constant 0 : index
    %19 = vector.load %arg1[%c0, %c0_3, %c0_4] : memref<2x16x64xbf16, #tpu.memory_space<vmem>>, vector<1x16x64xbf16>
    %20 = vector.shape_cast %19 : vector<1x16x64xbf16> to vector<16x64xbf16>
    %21 = vector.extract_strided_slice %20 {offsets = [0, 0], sizes = [4, 64], strides = [1, 1]} : vector<16x64xbf16> to vector<4x64xbf16>
    %22 = vector.extract_strided_slice %20 {offsets = [4, 0], sizes = [4, 64], strides = [1, 1]} : vector<16x64xbf16> to vector<4x64xbf16>
    %23 = vector.extract_strided_slice %20 {offsets = [8, 0], sizes = [4, 64], strides = [1, 1]} : vector<16x64xbf16> to vector<4x64xbf16>
    %24 = vector.extract_strided_slice %20 {offsets = [12, 0], sizes = [4, 64], strides = [1, 1]} : vector<16x64xbf16> to vector<4x64xbf16>
    %cst = arith.constant 0.000000e+00 : bf16
    %25 = vector.broadcast %cst : bf16 to vector<4x64xbf16>
    %26 = arith.select %18, %22, %25 : vector<4x64xi1>, vector<4x64xbf16>
    %cst_5 = arith.constant 0.000000e+00 : bf16
    %27 = vector.broadcast %cst_5 : bf16 to vector<4x64xbf16>
    %28 = arith.select %18, %24, %27 : vector<4x64xi1>, vector<4x64xbf16>
    %cst_6 = arith.constant 0.000000e+00 : bf16
    %29 = vector.broadcast %cst_6 : bf16 to vector<4x9xbf16>
    %c0_7 = arith.constant 0 : index
    %c0_8 = arith.constant 0 : index
    %30 = vector.load %arg6[%c0_7, %c0_8] : memref<36x128xbf16, #tpu.memory_space<vmem>>, vector<4x9xbf16>
    tpu.vector_store %arg6[%c0_7, %c0_8], %29 {strides = array<i32>} : memref<36x128xbf16, #tpu.memory_space<vmem>>, vector<4x9xbf16>,
    %31 = vector.extract_strided_slice %28 {offsets = [0, 0], sizes = [4, 55], strides = [1, 1]} : vector<4x64xbf16> to vector<4x55xbf16>
    %c0_9 = arith.constant 0 : index
    %c9 = arith.constant 9 : index
    %32 = vector.load %arg6[%c0_9, %c9] : memref<36x128xbf16, #tpu.memory_space<vmem>>, vector<4x55xbf16>
    tpu.vector_store %arg6[%c0_9, %c9], %31 {strides = array<i32>} : memref<36x128xbf16, #tpu.memory_space<vmem>>, vector<4x55xbf16>,
    %cst_10 = arith.constant 0.000000e+00 : bf16
    %33 = vector.broadcast %cst_10 : bf16 to vector<4x8xbf16>
    %c4 = arith.constant 4 : index
    %c0_11 = arith.constant 0 : index
    %34 = vector.load %arg6[%c4, %c0_11] : memref<36x128xbf16, #tpu.memory_space<vmem>>, vector<4x8xbf16>
    tpu.vector_store %arg6[%c4, %c0_11], %33 {strides = array<i32>} : memref<36x128xbf16, #tpu.memory_space<vmem>>, vector<4x8xbf16>,
    %35 = vector.extract_strided_slice %23 {offsets = [0, 0], sizes = [4, 56], strides = [1, 1]} : vector<4x64xbf16> to vector<4x56xbf16>
    %c4_12 = arith.constant 4 : index
    %c8 = arith.constant 8 : index
    %36 = vector.load %arg6[%c4_12, %c8] : memref<36x128xbf16, #tpu.memory_space<vmem>>, vector<4x56xbf16>
    tpu.vector_store %arg6[%c4_12, %c8], %35 {strides = array<i32>} : memref<36x128xbf16, #tpu.memory_space<vmem>>, vector<4x56xbf16>,
    %cst_13 = arith.constant 0.000000e+00 : bf16
    %37 = vector.broadcast %cst_13 : bf16 to vector<4x8xbf16>
    %c8_14 = arith.constant 8 : index
    %c0_15 = arith.constant 0 : index
    %38 = vector.load %arg6[%c8_14, %c0_15] : memref<36x128xbf16, #tpu.memory_space<vmem>>, vector<4x8xbf16>
    tpu.vector_store %arg6[%c8_14, %c0_15], %37 {strides = array<i32>} : memref<36x128xbf16, #tpu.memory_space<vmem>>, vector<4x8xbf16>,
    %39 = vector.extract_strided_slice %24 {offsets = [0, 0], sizes = [4, 56], strides = [1, 1]} : vector<4x64xbf16> to vector<4x56xbf16>
    %c8_16 = arith.constant 8 : index
    %c8_17 = arith.constant 8 : index
    %40 = vector.load %arg6[%c8_16, %c8_17] : memref<36x128xbf16, #tpu.memory_space<vmem>>, vector<4x56xbf16>
    tpu.vector_store %arg6[%c8_16, %c8_17], %39 {strides = array<i32>} : memref<36x128xbf16, #tpu.memory_space<vmem>>, vector<4x56xbf16>,
    %cst_18 = arith.constant 0.000000e+00 : bf16
    %41 = vector.broadcast %cst_18 : bf16 to vector<4x1xbf16>
    %c12 = arith.constant 12 : index
    %c0_19 = arith.constant 0 : index
    %42 = vector.load %arg6[%c12, %c0_19] : memref<36x128xbf16, #tpu.memory_space<vmem>>, vector<4x1xbf16>
    tpu.vector_store %arg6[%c12, %c0_19], %41 {strides = array<i32>} : memref<36x128xbf16, #tpu.memory_space<vmem>>, vector<4x1xbf16>,
    %43 = vector.extract_strided_slice %26 {offsets = [0, 0], sizes = [4, 63], strides = [1, 1]} : vector<4x64xbf16> to vector<4x63xbf16>
    %c12_20 = arith.constant 12 : index
    %c1 = arith.constant 1 : index
    %44 = vector.load %arg6[%c12_20, %c1] : memref<36x128xbf16, #tpu.memory_space<vmem>>, vector<4x63xbf16>
    tpu.vector_store %arg6[%c12_20, %c1], %43 {strides = array<i32>} : memref<36x128xbf16, #tpu.memory_space<vmem>>, vector<4x63xbf16>,
    %c16 = arith.constant 16 : index
    %c0_21 = arith.constant 0 : index
    %45 = vector.load %arg6[%c16, %c0_21] : memref<36x128xbf16, #tpu.memory_space<vmem>>, vector<4x64xbf16>
    tpu.vector_store %arg6[%c16, %c0_21], %21 {strides = array<i32>} : memref<36x128xbf16, #tpu.memory_space<vmem>>, vector<4x64xbf16>,
    %c20 = arith.constant 20 : index
    %c0_22 = arith.constant 0 : index
    %46 = vector.load %arg6[%c20, %c0_22] : memref<36x128xbf16, #tpu.memory_space<vmem>>, vector<4x64xbf16>
    tpu.vector_store %arg6[%c20, %c0_22], %22 {strides = array<i32>} : memref<36x128xbf16, #tpu.memory_space<vmem>>, vector<4x64xbf16>,
    %cst_23 = arith.constant 0.000000e+00 : bf16
    %47 = vector.broadcast %cst_23 : bf16 to vector<4x1xbf16>
    %c24 = arith.constant 24 : index
    %c0_24 = arith.constant 0 : index
    %48 = vector.load %arg6[%c24, %c0_24] : memref<36x128xbf16, #tpu.memory_space<vmem>>, vector<4x1xbf16>
    tpu.vector_store %arg6[%c24, %c0_24], %47 {strides = array<i32>} : memref<36x128xbf16, #tpu.memory_space<vmem>>, vector<4x1xbf16>,
    %49 = vector.extract_strided_slice %28 {offsets = [0, 0], sizes = [4, 63], strides = [1, 1]} : vector<4x64xbf16> to vector<4x63xbf16>
    %c24_25 = arith.constant 24 : index
    %c1_26 = arith.constant 1 : index
    %50 = vector.load %arg6[%c24_25, %c1_26] : memref<36x128xbf16, #tpu.memory_space<vmem>>, vector<4x63xbf16>
    tpu.vector_store %arg6[%c24_25, %c1_26], %49 {strides = array<i32>} : memref<36x128xbf16, #tpu.memory_space<vmem>>, vector<4x63xbf16>,
    %c28 = arith.constant 28 : index
    %c0_27 = arith.constant 0 : index
    %51 = vector.load %arg6[%c28, %c0_27] : memref<36x128xbf16, #tpu.memory_space<vmem>>, vector<4x64xbf16>
    tpu.vector_store %arg6[%c28, %c0_27], %23 {strides = array<i32>} : memref<36x128xbf16, #tpu.memory_space<vmem>>, vector<4x64xbf16>,
    %c32 = arith.constant 32 : index
    %c0_28 = arith.constant 0 : index
    %52 = vector.load %arg6[%c32, %c0_28] : memref<36x128xbf16, #tpu.memory_space<vmem>>, vector<4x64xbf16>
    tpu.vector_store %arg6[%c32, %c0_28], %24 {strides = array<i32>} : memref<36x128xbf16, #tpu.memory_space<vmem>>, vector<4x64xbf16>,
    %c1_29 = arith.constant 1 : index
    %c0_30 = arith.constant 0 : index
    %c0_31 = arith.constant 0 : index
    %53 = vector.load %arg1[%c1_29, %c0_30, %c0_31] : memref<2x16x64xbf16, #tpu.memory_space<vmem>>, vector<1x16x64xbf16>
    %54 = vector.shape_cast %53 : vector<1x16x64xbf16> to vector<16x64xbf16>
    %55 = vector.extract_strided_slice %54 {offsets = [0, 0], sizes = [4, 64], strides = [1, 1]} : vector<16x64xbf16> to vector<4x64xbf16>
    %56 = vector.extract_strided_slice %54 {offsets = [4, 0], sizes = [4, 64], strides = [1, 1]} : vector<16x64xbf16> to vector<4x64xbf16>
    %57 = vector.extract_strided_slice %54 {offsets = [8, 0], sizes = [4, 64], strides = [1, 1]} : vector<16x64xbf16> to vector<4x64xbf16>
    %58 = vector.extract_strided_slice %54 {offsets = [12, 0], sizes = [4, 64], strides = [1, 1]} : vector<16x64xbf16> to vector<4x64xbf16>
    %cst_32 = arith.constant 0.000000e+00 : bf16
    %59 = vector.broadcast %cst_32 : bf16 to vector<4x64xbf16>
    %60 = arith.select %18, %56, %59 : vector<4x64xi1>, vector<4x64xbf16>
    %cst_33 = arith.constant 0.000000e+00 : bf16
    %61 = vector.broadcast %cst_33 : bf16 to vector<4x64xbf16>
    %62 = arith.select %18, %58, %61 : vector<4x64xi1>, vector<4x64xbf16>
    %cst_34 = arith.constant 0.000000e+00 : bf16
    %63 = vector.broadcast %cst_34 : bf16 to vector<4x9xbf16>
    %c0_35 = arith.constant 0 : index
    %c64 = arith.constant 64 : index
    %64 = vector.load %arg6[%c0_35, %c64] : memref<36x128xbf16, #tpu.memory_space<vmem>>, vector<4x9xbf16>
    tpu.vector_store %arg6[%c0_35, %c64], %63 {strides = array<i32>} : memref<36x128xbf16, #tpu.memory_space<vmem>>, vector<4x9xbf16>,
    %65 = vector.extract_strided_slice %62 {offsets = [0, 0], sizes = [4, 55], strides = [1, 1]} : vector<4x64xbf16> to vector<4x55xbf16>
    %c0_36 = arith.constant 0 : index
    %c73 = arith.constant 73 : index
    %66 = vector.load %arg6[%c0_36, %c73] : memref<36x128xbf16, #tpu.memory_space<vmem>>, vector<4x55xbf16>
    tpu.vector_store %arg6[%c0_36, %c73], %65 {strides = array<i32>} : memref<36x128xbf16, #tpu.memory_space<vmem>>, vector<4x55xbf16>,
    %cst_37 = arith.constant 0.000000e+00 : bf16
    %67 = vector.broadcast %cst_37 : bf16 to vector<4x8xbf16>
    %c4_38 = arith.constant 4 : index
    %c64_39 = arith.constant 64 : index
    %68 = vector.load %arg6[%c4_38, %c64_39] : memref<36x128xbf16, #tpu.memory_space<vmem>>, vector<4x8xbf16>
    tpu.vector_store %arg6[%c4_38, %c64_39], %67 {strides = array<i32>} : memref<36x128xbf16, #tpu.memory_space<vmem>>, vector<4x8xbf16>,
    %69 = vector.extract_strided_slice %57 {offsets = [0, 0], sizes = [4, 56], strides = [1, 1]} : vector<4x64xbf16> to vector<4x56xbf16>
    %c4_40 = arith.constant 4 : index
    %c72 = arith.constant 72 : index
    %70 = vector.load %arg6[%c4_40, %c72] : memref<36x128xbf16, #tpu.memory_space<vmem>>, vector<4x56xbf16>
    tpu.vector_store %arg6[%c4_40, %c72], %69 {strides = array<i32>} : memref<36x128xbf16, #tpu.memory_space<vmem>>, vector<4x56xbf16>,
    %cst_41 = arith.constant 0.000000e+00 : bf16
    %71 = vector.broadcast %cst_41 : bf16 to vector<4x8xbf16>
    %c8_42 = arith.constant 8 : index
    %c64_43 = arith.constant 64 : index
    %72 = vector.load %arg6[%c8_42, %c64_43] : memref<36x128xbf16, #tpu.memory_space<vmem>>, vector<4x8xbf16>
    tpu.vector_store %arg6[%c8_42, %c64_43], %71 {strides = array<i32>} : memref<36x128xbf16, #tpu.memory_space<vmem>>, vector<4x8xbf16>,
    %73 = vector.extract_strided_slice %58 {offsets = [0, 0], sizes = [4, 56], strides = [1, 1]} : vector<4x64xbf16> to vector<4x56xbf16>
    %c8_44 = arith.constant 8 : index
    %c72_45 = arith.constant 72 : index
    %74 = vector.load %arg6[%c8_44, %c72_45] : memref<36x128xbf16, #tpu.memory_space<vmem>>, vector<4x56xbf16>
    tpu.vector_store %arg6[%c8_44, %c72_45], %73 {strides = array<i32>} : memref<36x128xbf16, #tpu.memory_space<vmem>>, vector<4x56xbf16>,
    %cst_46 = arith.constant 0.000000e+00 : bf16
    %75 = vector.broadcast %cst_46 : bf16 to vector<4x1xbf16>
    %c12_47 = arith.constant 12 : index
    %c64_48 = arith.constant 64 : index
    %76 = vector.load %arg6[%c12_47, %c64_48] : memref<36x128xbf16, #tpu.memory_space<vmem>>, vector<4x1xbf16>
    tpu.vector_store %arg6[%c12_47, %c64_48], %75 {strides = array<i32>} : memref<36x128xbf16, #tpu.memory_space<vmem>>, vector<4x1xbf16>,
    %77 = vector.extract_strided_slice %60 {offsets = [0, 0], sizes = [4, 63], strides = [1, 1]} : vector<4x64xbf16> to vector<4x63xbf16>
    %c12_49 = arith.constant 12 : index
    %c65 = arith.constant 65 : index
    %78 = vector.load %arg6[%c12_49, %c65] : memref<36x128xbf16, #tpu.memory_space<vmem>>, vector<4x63xbf16>
    tpu.vector_store %arg6[%c12_49, %c65], %77 {strides = array<i32>} : memref<36x128xbf16, #tpu.memory_space<vmem>>, vector<4x63xbf16>,
    %c16_50 = arith.constant 16 : index
    %c64_51 = arith.constant 64 : index
    %79 = vector.load %arg6[%c16_50, %c64_51] : memref<36x128xbf16, #tpu.memory_space<vmem>>, vector<4x64xbf16>
    tpu.vector_store %arg6[%c16_50, %c64_51], %55 {strides = array<i32>} : memref<36x128xbf16, #tpu.memory_space<vmem>>, vector<4x64xbf16>,
    %c20_52 = arith.constant 20 : index
    %c64_53 = arith.constant 64 : index
    %80 = vector.load %arg6[%c20_52, %c64_53] : memref<36x128xbf16, #tpu.memory_space<vmem>>, vector<4x64xbf16>
    tpu.vector_store %arg6[%c20_52, %c64_53], %56 {strides = array<i32>} : memref<36x128xbf16, #tpu.memory_space<vmem>>, vector<4x64xbf16>,
    %cst_54 = arith.constant 0.000000e+00 : bf16
    %81 = vector.broadcast %cst_54 : bf16 to vector<4x1xbf16>
    %c24_55 = arith.constant 24 : index
    %c64_56 = arith.constant 64 : index
    %82 = vector.load %arg6[%c24_55, %c64_56] : memref<36x128xbf16, #tpu.memory_space<vmem>>, vector<4x1xbf16>
    tpu.vector_store %arg6[%c24_55, %c64_56], %81 {strides = array<i32>} : memref<36x128xbf16, #tpu.memory_space<vmem>>, vector<4x1xbf16>,
    %83 = vector.extract_strided_slice %62 {offsets = [0, 0], sizes = [4, 63], strides = [1, 1]} : vector<4x64xbf16> to vector<4x63xbf16>
    %c24_57 = arith.constant 24 : index
    %c65_58 = arith.constant 65 : index
    %84 = vector.load %arg6[%c24_57, %c65_58] : memref<36x128xbf16, #tpu.memory_space<vmem>>, vector<4x63xbf16>
    tpu.vector_store %arg6[%c24_57, %c65_58], %83 {strides = array<i32>} : memref<36x128xbf16, #tpu.memory_space<vmem>>, vector<4x63xbf16>,
    %c28_59 = arith.constant 28 : index
    %c64_60 = arith.constant 64 : index
    %85 = vector.load %arg6[%c28_59, %c64_60] : memref<36x128xbf16, #tpu.memory_space<vmem>>, vector<4x64xbf16>
    tpu.vector_store %arg6[%c28_59, %c64_60], %57 {strides = array<i32>} : memref<36x128xbf16, #tpu.memory_space<vmem>>, vector<4x64xbf16>,
    %c32_61 = arith.constant 32 : index
    %c64_62 = arith.constant 64 : index
    %86 = vector.load %arg6[%c32_61, %c64_62] : memref<36x128xbf16, #tpu.memory_space<vmem>>, vector<4x64xbf16>
    tpu.vector_store %arg6[%c32_61, %c64_62], %58 {strides = array<i32>} : memref<36x128xbf16, #tpu.memory_space<vmem>>, vector<4x64xbf16>,
    %c0_63 = arith.constant 0 : index
    %c0_64 = arith.constant 0 : index
    %87 = vector.load %arg2[%c0_63, %c0_64] : memref<8x36xbf16, #tpu.memory_space<vmem>>, vector<8x36xbf16>
    %c0_65 = arith.constant 0 : index
    %c0_66 = arith.constant 0 : index
    %88 = vector.load %arg6[%c0_65, %c0_66] : memref<36x128xbf16, #tpu.memory_space<vmem>>, vector<36x128xbf16>
    %cst_67 = arith.constant dense<0.000000e+00> : vector<8x128xf32>
    %89 = tpu.matmul %87, %88, %cst_67 {dimension_numbers = #tpu.dot_dimension_numbers<[1], [0], [0], [1], [0, 0, 1, 1], [], []>} : vector<8x36xbf16>, vector<36x128xbf16>, vector<8x128xf32> -> vector<8x128xf32>
    %90 = vector.extract_strided_slice %89 {offsets = [0, 0], sizes = [8, 64], strides = [1, 1]} : vector<8x128xf32> to vector<8x64xf32>
    %cst_68 = arith.constant dense<0.000000e+00> : vector<8xf32>
    %91 = vector.multi_reduction <add>, %90, %cst_68 [1] : vector<8x64xf32> to vector<8xf32>
    %92 = vector.shape_cast %91 : vector<8xf32> to vector<8x1xf32>
    %cst_69 = arith.constant dense<0.000000e+00> : vector<1xf32>
    %93 = vector.multi_reduction <add>, %92, %cst_69 [0] : vector<8x1xf32> to vector<1xf32>
    %94 = vector.shape_cast %93 : vector<1xf32> to vector<1x1xf32>
    %95 = arith.mulf %90, %90 : vector<8x64xf32>
    %cst_70 = arith.constant dense<0.000000e+00> : vector<8xf32>
    %96 = vector.multi_reduction <add>, %95, %cst_70 [1] : vector<8x64xf32> to vector<8xf32>
    %97 = vector.shape_cast %96 : vector<8xf32> to vector<8x1xf32>
    %cst_71 = arith.constant dense<0.000000e+00> : vector<1xf32>
    %98 = vector.multi_reduction <add>, %97, %cst_71 [0] : vector<8x1xf32> to vector<1xf32>
    %99 = vector.shape_cast %98 : vector<1xf32> to vector<1x1xf32>
    %cst_72 = arith.constant 0.001953125 : f32
    %100 = vector.broadcast %cst_72 : f32 to vector<1x1xf32>
    %101 = arith.mulf %94, %100 : vector<1x1xf32>
    %cst_73 = arith.constant 0.001953125 : f32
    %102 = vector.broadcast %cst_73 : f32 to vector<1x1xf32>
    %103 = arith.mulf %99, %102 : vector<1x1xf32>
    %104 = arith.mulf %101, %101 : vector<1x1xf32>
    %105 = arith.subf %103, %104 : vector<1x1xf32>
    %cst_74 = arith.constant 9.99999974E-6 : f32
    %106 = vector.broadcast %cst_74 : f32 to vector<1x1xf32>
    %107 = arith.addf %105, %106 : vector<1x1xf32>
    %108 = math.rsqrt %107 : vector<1x1xf32>
    %c0_75 = arith.constant 0 : index
    %c0_76 = arith.constant 0 : index
    %109 = vector.load %arg3[%c0_75, %c0_76] : memref<8x1xf32, #tpu.memory_space<vmem>>, vector<8x1xf32>
    %110 = vector.broadcast %108 : vector<1x1xf32> to vector<8x1xf32>
    %111 = arith.mulf %109, %110 : vector<8x1xf32>
    %c0_77 = arith.constant 0 : index
    %c0_78 = arith.constant 0 : index
    %112 = vector.load %arg4[%c0_77, %c0_78] : memref<8x1xf32, #tpu.memory_space<vmem>>, vector<8x1xf32>
    %113 = vector.broadcast %101 : vector<1x1xf32> to vector<8x1xf32>
    %114 = arith.mulf %113, %111 : vector<8x1xf32>
    %115 = arith.subf %112, %114 : vector<8x1xf32>
    %116 = vector.broadcast %111 : vector<8x1xf32> to vector<8x64xf32>
    %117 = arith.mulf %90, %116 : vector<8x64xf32>
    %118 = vector.broadcast %115 : vector<8x1xf32> to vector<8x64xf32>
    %119 = arith.addf %117, %118 : vector<8x64xf32>
    %c0_79 = arith.constant 0 : index
    %c0_80 = arith.constant 0 : index
    %c0_81 = arith.constant 0 : index
    %120 = vector.load %arg5[%c0_79, %c0_80, %c0_81] : memref<2x8x64xf32, #tpu.memory_space<vmem>>, vector<1x8x64xf32>
    %121 = vector.shape_cast %120 : vector<1x8x64xf32> to vector<8x64xf32>
    %122 = vector.shape_cast %119 : vector<8x64xf32> to vector<1x8x64xf32>
    tpu.vector_store %arg5[%c0_79, %c0_80, %c0_81], %122 {strides = array<i32>} : memref<2x8x64xf32, #tpu.memory_space<vmem>>, vector<1x8x64xf32>,
    %123 = vector.extract_strided_slice %89 {offsets = [0, 64], sizes = [8, 64], strides = [1, 1]} : vector<8x128xf32> to vector<8x64xf32>
    %cst_82 = arith.constant dense<0.000000e+00> : vector<8xf32>
    %124 = vector.multi_reduction <add>, %123, %cst_82 [1] : vector<8x64xf32> to vector<8xf32>
    %125 = vector.shape_cast %124 : vector<8xf32> to vector<8x1xf32>
    %cst_83 = arith.constant dense<0.000000e+00> : vector<1xf32>
    %126 = vector.multi_reduction <add>, %125, %cst_83 [0] : vector<8x1xf32> to vector<1xf32>
    %127 = vector.shape_cast %126 : vector<1xf32> to vector<1x1xf32>
    %128 = arith.mulf %123, %123 : vector<8x64xf32>
    %cst_84 = arith.constant dense<0.000000e+00> : vector<8xf32>
    %129 = vector.multi_reduction <add>, %128, %cst_84 [1] : vector<8x64xf32> to vector<8xf32>
    %130 = vector.shape_cast %129 : vector<8xf32> to vector<8x1xf32>
    %cst_85 = arith.constant dense<0.000000e+00> : vector<1xf32>
    %131 = vector.multi_reduction <add>, %130, %cst_85 [0] : vector<8x1xf32> to vector<1xf32>
    %132 = vector.shape_cast %131 : vector<1xf32> to vector<1x1xf32>
    %cst_86 = arith.constant 0.001953125 : f32
    %133 = vector.broadcast %cst_86 : f32 to vector<1x1xf32>
    %134 = arith.mulf %127, %133 : vector<1x1xf32>
    %cst_87 = arith.constant 0.001953125 : f32
    %135 = vector.broadcast %cst_87 : f32 to vector<1x1xf32>
    %136 = arith.mulf %132, %135 : vector<1x1xf32>
    %137 = arith.mulf %134, %134 : vector<1x1xf32>
    %138 = arith.subf %136, %137 : vector<1x1xf32>
    %cst_88 = arith.constant 9.99999974E-6 : f32
    %139 = vector.broadcast %cst_88 : f32 to vector<1x1xf32>
    %140 = arith.addf %138, %139 : vector<1x1xf32>
    %141 = math.rsqrt %140 : vector<1x1xf32>
    %c0_89 = arith.constant 0 : index
    %c0_90 = arith.constant 0 : index
    %142 = vector.load %arg3[%c0_89, %c0_90] : memref<8x1xf32, #tpu.memory_space<vmem>>, vector<8x1xf32>
    %143 = vector.broadcast %141 : vector<1x1xf32> to vector<8x1xf32>
    %144 = arith.mulf %142, %143 : vector<8x1xf32>
    %c0_91 = arith.constant 0 : index
    %c0_92 = arith.constant 0 : index
    %145 = vector.load %arg4[%c0_91, %c0_92] : memref<8x1xf32, #tpu.memory_space<vmem>>, vector<8x1xf32>
    %146 = vector.broadcast %134 : vector<1x1xf32> to vector<8x1xf32>
    %147 = arith.mulf %146, %144 : vector<8x1xf32>
    %148 = arith.subf %145, %147 : vector<8x1xf32>
    %149 = vector.broadcast %144 : vector<8x1xf32> to vector<8x64xf32>
    %150 = arith.mulf %123, %149 : vector<8x64xf32>
    %151 = vector.broadcast %148 : vector<8x1xf32> to vector<8x64xf32>
    %152 = arith.addf %150, %151 : vector<8x64xf32>
    %c1_93 = arith.constant 1 : index
    %c0_94 = arith.constant 0 : index
    %c0_95 = arith.constant 0 : index
    %153 = vector.load %arg5[%c1_93, %c0_94, %c0_95] : memref<2x8x64xf32, #tpu.memory_space<vmem>>, vector<1x8x64xf32>
    %154 = vector.shape_cast %153 : vector<1x8x64xf32> to vector<8x64xf32>
    %155 = vector.shape_cast %152 : vector<8x64xf32> to vector<1x8x64xf32>
    tpu.vector_store %arg5[%c1_93, %c0_94, %c0_95], %155 {strides = array<i32>} : memref<2x8x64xf32, #tpu.memory_space<vmem>>, vector<1x8x64xf32>,
    return
  }
  func.func @transform_0(%arg0: i32) -> (i32, i32, i32) {
    %c0_i32 = arith.constant 0 : i32
    %c0_i32_0 = arith.constant 0 : i32
    %c0_i32_1 = arith.constant 0 : i32
    return %arg0, %c0_i32, %c0_i32_0 : i32, i32, i32
  }
  func.func @transform_1(%arg0: i32) -> (i32, i32) {
    %c0_i32 = arith.constant 0 : i32
    %c0_i32_0 = arith.constant 0 : i32
    %c0_i32_1 = arith.constant 0 : i32
    return %c0_i32, %c0_i32_0 : i32, i32
  }
  func.func @transform_2(%arg0: i32) -> (i32, i32) {
    %c0_i32 = arith.constant 0 : i32
    %c0_i32_0 = arith.constant 0 : i32
    %c0_i32_1 = arith.constant 0 : i32
    return %c0_i32, %c0_i32_0 : i32, i32
  }
  func.func @transform_3(%arg0: i32) -> (i32, i32) {
    %c0_i32 = arith.constant 0 : i32
    %c0_i32_0 = arith.constant 0 : i32
    %c0_i32_1 = arith.constant 0 : i32
    return %c0_i32, %c0_i32_0 : i32, i32
  }
  func.func @transform_4(%arg0: i32) -> (i32, i32, i32) {
    %c0_i32 = arith.constant 0 : i32
    %c0_i32_0 = arith.constant 0 : i32
    %c0_i32_1 = arith.constant 0 : i32
    return %arg0, %c0_i32, %c0_i32_0 : i32, i32, i32
  }
}

</mosaic_0001>

<bundles_post_ra>
// kernel: tpu_custom_call.1
= control target key start
LH: loop header
LB: loop body
LE: loop exit
PB: predicated region body
PF: predicated region fallthrough
CT: control target
= control target key end

     0   :  { %v19_v2 = vlaneseq  ;;  %s401_s19 = smov 72   ;;  %s402_s20 = smov 8   ;;  %vm49_vm0 = vcmask 60418   ;;  %v403_v9 = vmov 0   ;;  %vm58_vm1 = vcmask 58368   ;;  %s524_s0 = inlined_call_operand.vmem [shape: bf16[2,16,64], index: 0, kind: input, shape index: {}]   ;;  %s525_s1 = inlined_call_operand.vmem [shape: bf16[8,36], index: 1, kind: input, shape index: {}]   ;;  %s526_s2 = inlined_call_operand.vmem [shape: f32[8,1], index: 2, kind: input, shape index: {}]   ;;  %s527_s3 = inlined_call_operand.vmem [shape: f32[8,1], index: 3, kind: input, shape index: {}]   ;;  %s528_s4 = inlined_call_operand.hbm [shape: f32[2,8,64], index: 4, kind: output, shape index: {}]  }
   0x1   :  { %v337_v0 = vld [vmem:[%s524_s0 + $0xc] sm:$0xf]  ;;  %v35_v1 = vld [vmem:[%s524_s0 + $0x4] sm:$0xf]  ;;  %50 = vst.msk [vmem:[#allocation2] sm:$0xc] %vm49_vm0, %v403_v9  ;;  %368 = vset.pattern.permute.xlu0 %v403_v9  ;;  %369 = vset.pattern.permute.xlu1 %v403_v9 }
   0x2   :  { %v107_v3 = vrot.slane %v337_v0, 6  ;;  %v52_v4 = vrot.slane %v35_v1, 6  ;;  %v20_v5 = vand.u32 127, %v19_v2 }
   0x4   :  { %108 = vrot.lane.b32.xlu1 %v107_v3, %s401_s19  ;;  %53 = vrot.lane.b32.xlu0 %v52_v4, %s402_s20  ;;  %v60_v6 = vrot.slane %v52_v4, 4  ;;  %v115_v7 = vrot.slane %v107_v3, 4  ;;  %v25_v8 = vand.u32 7, %v20_v5 }
   0x5   :  { %9 = vsyncpa [#allocation4], 0  ;;  %v34_v10 = vld [vmem:[%s524_s0] sm:$0xf]  ;;  %59 = vst.msk [vmem:[#allocation2 + $0x4] sm:$0x3] %vm58_vm1, %v403_v9 }
   0x6   :  { %vm66_vm2 = vcmask 3074   ;;  %vm33_vm3 = vcmp.ne.s32.totalorder %v25_v8, 7  ;;  %vm39_vm4 = vcmask 66560   ;;  %v336_v16 = vld [vmem:[%s524_s0 + $0x8] sm:$0xf]  ;;  %vm78_vm6 = vcmask 1024  }
   0x7   :  { %67 = vst.msk [vmem:[#allocation2 + $0x4] sm:$0xc] %vm66_vm2, %v403_v9  ;;  %vm454_vm5 = vmpackc.low %vm33_vm3, %vm33_vm3  ;;  %vm74_vm7 = vcmask 517120   ;;  %vm76_vm8 = vcmask 519170   ;;  %s404_s25 = smov 1   ;;  %s405_s26 = smov 9  }
   0x8   :  { %61 = vrot.lane.b32.xlu1 %v60_v6, %s402_s20  ;;  %116 = vrot.lane.b32.xlu0 %v115_v7, %s401_s19  ;;  %40 = vst.msk [vmem:[#allocation2] sm:$0x3] %vm39_vm4, %v403_v9  ;;  %v37_v12 = vsel %vm454_vm5, %v34_v10, 0  ;;  %v38_v13 = vsel %vm454_vm5, %v35_v1, 0  ;;  %v93_v14 = vsel %vm454_vm5, %v337_v0, 0  ;;  %v92_v19 = vsel %vm454_vm5, %v336_v16, 0 }
   0x9   :  { %v42_v15 = vrot.slane %v38_v13, 6  ;;  %v97_v17 = vrot.slane %v93_v14, 6  ;;  %79 = vst.msk [vmem:[#allocation2 + $0xc] sm:$0x3] %vm78_vm6, %v403_v9  ;;  %v406_v21 = vmov 0.0   ;;  %s407_s0 = smov 65  }
   0xa   :  { %75 = vst.msk [vmem:[#allocation2 + $0x8] sm:$0x3] %vm74_vm7, %v34_v10  ;;  %88 = vst.msk [vmem:[#allocation2 + $0x10] sm:$0x3] %vm74_vm7, %v60_v6  ;;  %346 = vmatprep.subr.bf16.mxu0 %v406_v21  ;;  %s408_s27 = smov 73   ;;  %s409_s28 = smov 64  }
   0xb   :  { %v43_v18 = vrot.slane %v42_v15, 4  ;;  %77 = vst.msk [vmem:[#allocation2 + $0x8] sm:$0xc] %vm76_vm8, %v34_v10  ;;  %86 = vst.msk [vmem:[#allocation2 + $0xc] sm:$0xc] %vm76_vm8, %v52_v4  ;;  %v98_v20 = vrot.slane %v97_v17, 4 }
   0xc   :  { %69 = vrot.lane.b32.xlu1 %v37_v12, %s404_s25  ;;  %vm410_vm9 = vmmov 0   ;;  %vm56_vm10 = vcmask 519234   ;;  %vm104_vm11 = vcmask 585218   ;;  %vm111_vm12 = vcmask 1044034   ;;  %v152_v39 = vld [vmem:[%s525_s1] sm:$0xf] }
   0xd   :  { %44 = vrot.lane.b32.xlu0 %v43_v18, %s405_s26  ;;  %352 = vmatprep.mubr.msk.bf16.mxu0 %vm410_vm9, %v406_v21  ;;  %vm64_vm13 = vcmask 517184   ;;  %vm113_vm14 = vcmask 583168   ;;  %vm119_vm15 = vcmask 1041984   ;;  %vm72_vm0 = vcmask 519178  }
   0xe   :  { %vm121_vm1 = vcmask 527874   ;;  %vm47_vm2 = vcmask 517192   ;;  %vm94_vm3 = vcmask 591360   ;;  %vm127_vm4 = vcmask 1043978  }
   0xf   :  { %vm102_vm5 = vcmask 1041992   ;;  %vm133_vm6 = vcmask 1041920   ;;  %vm135_vm7 = vcmask 1043970   ;;  %vm83_vm8 = vcmask 517128  }
  0x10   :  { %124 = vrot.lane.b32.xlu1 %v92_v19, %s407_s0  ;;  %vm137_vm9 = vcmask 525824  }
  0x11   :  { %99 = vrot.lane.b32.xlu0 %v98_v20, %s408_s27 }
  0x14   :  { %130 = vrot.lane.b32.xlu1 %v336_v16, %s409_s28 }
  0x15   :  { %80 = vrot.lane.b32.xlu0 %v43_v18, %s404_s25 }
  0x18   :  { %144 = vrot.lane.b32.xlu1 %v107_v3, %s409_s28 }
  0x19   :  { %139 = vrot.lane.b32.xlu0 %v98_v20, %s407_s0 }
  0x1d   :  { %148 = vrot.lane.b32.xlu0 %v115_v7, %s409_s28 }
  0x76   :  { %v109_v22 = vpop.permute.xlu1 %108  ;;  %v54_v23 = vpop.permute.xlu0 %53 }
  0x77   :  { %57 = vst.msk [vmem:[#allocation2] sm:$0xc] %vm56_vm10, %v54_v23  ;;  %vm142_vm10 = vcmask 1041928  }
  0x78   :  { %105 = vst.msk [vmem:[#allocation2] sm:$0xc] %vm104_vm11, %v403_v9  ;;  %vm177_vm11 = vcmask 1041408  }
  0x79   :  { %112 = vst.msk [vmem:[#allocation2] sm:$0xc] %vm111_vm12, %v109_v22  ;;  %vm173_vm12 = vcmask 293888  }
  0x7a   :  { %v62_v24 = vpop.permute.xlu1 %61  ;;  %v117_v25 = vpop.permute.xlu0 %116 }
  0x7b   :  { %65 = vst.msk [vmem:[#allocation2 + $0x4] sm:$0x3] %vm64_vm13, %v62_v24  ;;  %vm221_vm13 = vcmask 523264  }
  0x7c   :  { %114 = vst.msk [vmem:[#allocation2 + $0x4] sm:$0x3] %vm113_vm14, %v403_v9 }
  0x7d   :  { %120 = vst.msk [vmem:[#allocation2 + $0x4] sm:$0x3] %vm119_vm15, %v117_v25  ;;  %v297_v25 = vld [vmem:[%s526_s2] sm:$0xff]  ;;  %s411_s2 = smov [#allocation3]  }
  0x7e   :  { %v70_v26 = vpop.permute.xlu1 %69 }
  0x7f   :  { %73 = vst.msk [vmem:[#allocation2 + $0x4] sm:$0xc] %vm72_vm0, %v70_v26  ;;  %v45_v27 = vpop.permute.xlu0 %44 }
  0x80   :  { %122 = vst.msk [vmem:[#allocation2 + $0x4] sm:$0xc] %vm121_vm1, %v403_v9 }
  0x81   :  { %48 = vst.msk [vmem:[#allocation2] sm:$0x3] %vm47_vm2, %v45_v27 }
  0x82   :  { %v125_v28 = vpop.permute.xlu1 %124  ;;  %95 = vst.msk [vmem:[#allocation2] sm:$0x3] %vm94_vm3, %v403_v9 }
  0x83   :  { %128 = vst.msk [vmem:[#allocation2 + $0x4] sm:$0xc] %vm127_vm4, %v125_v28  ;;  %v100_v29 = vpop.permute.xlu0 %99  ;;  %v299_v28 = vld [vmem:[%s527_s3] sm:$0xff]  ;;  %s325_s3 = sshll.u32 %s411_s2, 4  ;;  %s326_s3 = int_to_ptr.vmem [resolvable:$true] %s325_s3 }
  0x84   :  { %103 = vst.msk [vmem:[#allocation2] sm:$0x3] %vm102_vm5, %v100_v29  ;;  %s377_s8 = scalar_lea.vmem %s326_s3, 256  ;;  %p382_p1 = scmp.lt.s32.totalorder %s326_s3, %s326_s3 }
  0x85   :  { %p378_p0 = scmp.ne.s32.totalorder %s326_s3, %s377_s8  ;;  %p383_p2 = scmp.lt.s32.totalorder %s377_s8, %s377_s8 }
  0x86   :  { %v131_v30 = vpop.permute.xlu1 %130 }
  0x87   :  { %134 = vst.msk [vmem:[#allocation2 + $0x8] sm:$0x3] %vm133_vm6, %v131_v30  ;;  %v81_v31 = vpop.permute.xlu0 %80  ;;  %p384_p3 = por %p383_p2, %p382_p1 }
  0x88   :  { %136 = vst.msk [vmem:[#allocation2 + $0x8] sm:$0xc] %vm135_vm7, %v131_v30 }
  0x89   :  { %84 = vst.msk [vmem:[#allocation2 + $0xc] sm:$0x3] %vm83_vm8, %v81_v31  ;;  %p385_p4 = pnand %p384_p3, %p378_p0 }
  0x8a   :  { %138 = vst.msk [vmem:[#allocation2 + $0xc] sm:$0x3] %vm137_vm9, %v403_v9  ;;  %v145_v32 = vpop.permute.xlu1 %144 }
  0x8b   :  { %147 = vst.msk [vmem:[#allocation2 + $0xc] sm:$0xc] %vm135_vm7, %v145_v32  ;;  %v140_v33 = vpop.permute.xlu0 %139  ;;  %v370_v34 = vld [vmem:[#allocation2] sm:$0xff]  }
  0x8c   :  { %143 = vst.msk [vmem:[#allocation2 + $0xc] sm:$0x3] %vm142_vm10, %v140_v33  ;;  %347 = vmatpush3.bf16.msra.mxu0 %v370_v34 }
  0x8d   :  { %348 = vmatprep.subr.bf16.mxu0 %v406_v21 }
  0x8f   :  { %v149_v35 = vpop.permute.xlu0 %148 }
  0x90   :  { %151 = vst.msk [vmem:[#allocation2 + $0x10] sm:$0x3] %vm133_vm6, %v149_v35 }
  0x93   :  { %v371_v36 = vld [vmem:[#allocation2 + $0x8] sm:$0xff]  }
  0x94   :  { %349 = vmatpush3.bf16.msra.mxu0 %v371_v36 }
  0x95   :  { %350 = vmatprep.subr.bf16.mxu0 %v406_v21 }
  0x97   :  { %v372_v37 = vld [vmem:[#allocation2 + $0x10] ss:$0 sps:$4 sm:$0x33]  }
  0x98   :  { %v179_v38 = vsel %vm177_vm11, %v372_v37, 0 }
  0x99   :  { %351 = vmatpush3.bf16.msra.mxu0 %v179_v38 }
  0x9c   :  { %353 = vmatmul.mubr.msk.bf16.vlgmr.msra.gmra.mrb[0].mxu0 %vm173_vm12, %v152_v39 }
 0x16f   :  { %v488_v40 = vpop.f32.mrb[0].mxu0 }
 0x170   :  { %266 = vrot.lane.b32.xlu1 %v488_v40, %s409_s28  ;;  %v354_v41 = vpop.f32.mrb[1].mxu0  ;;  %v231_v42 = vmul.f32 %v488_v40, %v488_v40  ;;  %v222_v50 = vsel %vm221_vm13, %v488_v40, 0.0 }
 0x171   :  { %v218_v43 = vpop.f32.mrb[2].mxu0 }
 0x172   :  { %279 = vrot.lane.b32.xlu0 %v231_v42, %s409_s28  ;;  %v355_v44 = vpop.f32.mrb[3].mxu0  ;;  %v232_v49 = vsel %vm221_vm13, %v231_v42, 0.0 }
 0x1e2   :  { %v267_v45 = vpop.permute.xlu1 %266 }
 0x1e3   :  { %v269_v46 = vsel %vm221_vm13, %v267_v45, 0.0 }
 0x1e4   :  { %270 = vadd.xlane.f32.xlu1 %v269_v46  ;;  %v280_v47 = vpop.permute.xlu0 %279 }
 0x1e5   :  { %v282_v48 = vsel %vm221_vm13, %v280_v47, 0.0 }
 0x1e6   :  { %283 = vadd.xlane.f32.xlu0 %v282_v48 }
 0x1e8   :  { %233 = vadd.xlane.f32.xlu1 %v232_v49 }
 0x1ea   :  { %223 = vadd.xlane.f32.xlu0 %v222_v50 }
 0x271   :  { %v271_v51 = vpop.xlane.xlu1 %270 }
 0x272   :  { %v272_v52 = vrot.slane %v271_v51, 4 }
 0x273   :  { %v284_v53 = vpop.xlane.xlu0 %283 }
 0x274   :  { %v273_v54 = vadd.f32 %v272_v52, %v271_v51  ;;  %v285_v55 = vrot.slane %v284_v53, 4 }
 0x275   :  { %v234_v56 = vpop.xlane.xlu1 %233 }
 0x276   :  { %v274_v57 = vrot.slane %v273_v54, 2  ;;  %v286_v58 = vadd.f32 %v285_v55, %v284_v53  ;;  %v235_v59 = vrot.slane %v234_v56, 4 }
 0x277   :  { %v224_v60 = vpop.xlane.xlu0 %223 }
 0x278   :  { %v275_v61 = vadd.f32 %v274_v57, %v273_v54  ;;  %v287_v62 = vrot.slane %v286_v58, 2  ;;  %v236_v63 = vadd.f32 %v235_v59, %v234_v56  ;;  %v225_v0 = vrot.slane %v224_v60, 4 }
 0x27a   :  { %v276_v1 = vrot.slane %v275_v61, 1  ;;  %v288_v2 = vadd.f32 %v287_v62, %v286_v58  ;;  %v237_v3 = vrot.slane %v236_v63, 2  ;;  %v226_v4 = vadd.f32 %v225_v0, %v224_v60 }
 0x27c   :  { %v277_v5 = vadd.f32 %v276_v1, %v275_v61  ;;  %v289_v6 = vrot.slane %v288_v2, 1  ;;  %v238_v7 = vadd.f32 %v237_v3, %v236_v63  ;;  %v227_v8 = vrot.slane %v226_v4, 2 }
 0x27e   :  { %v291_v9 = vmul.f32 0.001953125, %v277_v5  ;;  %v290_v10 = vadd.f32 %v289_v6, %v288_v2  ;;  %v239_v11 = vrot.slane %v238_v7, 1  ;;  %v228_v12 = vadd.f32 %v227_v8, %v226_v4 }
 0x280   :  { %v293_v13 = vmul.f32 %v291_v9, %v291_v9  ;;  %v292_v14 = vmul.f32 0.001953125, %v290_v10  ;;  %v229_v15 = vrot.slane %v228_v12, 1  ;;  %v240_v17 = vadd.f32 %v239_v11, %v238_v7 }
 0x282   :  { %v294_v16 = vsub.f32 %v292_v14, %v293_v13  ;;  %v230_v18 = vadd.f32 %v229_v15, %v228_v12  ;;  %v242_v21 = vmul.f32 0.001953125, %v240_v17 }
 0x284   :  { %v295_v19 = vadd.f32 1e-05, %v294_v16  ;;  %v241_v20 = vmul.f32 0.001953125, %v230_v18 }
 0x286   :  { %373 = vrsqrt.f32 %v295_v19  ;;  %v243_v22 = vmul.f32 %v241_v20, %v241_v20 }
 0x288   :  { %v244_v23 = vsub.f32 %v242_v21, %v243_v22 }
 0x28a   :  { %v245_v24 = vadd.f32 1e-05, %v244_v23 }
 0x28c   :  { %375 = vrsqrt.f32 %v245_v24 }
 0x290   :  { %v374_v26 = vpop.eup %373 }
 0x291   :  { %v298_v27 = vmul.f32 %v374_v26, %v297_v25 }
 0x293   :  { %304 = vperm.xlu0 %368, %v298_v27   ;;  %v300_v29 = vmul.f32 %v298_v27, %v291_v9 }
 0x295   :  { %v301_v30 = vsub.f32 %v299_v28, %v300_v29 }
 0x296   :  { %v376_v31 = vpop.eup %375 }
 0x297   :  { %310 = vperm.xlu1 %369, %v301_v30   ;;  %v248_v32 = vmul.f32 %v376_v31, %v297_v25 }
 0x299   :  { %v250_v33 = vmul.f32 %v248_v32, %v241_v20 }
 0x29b   :  { %254 = vperm.xlu1 %369, %v248_v32   ;;  %v251_v34 = vsub.f32 %v299_v28, %v250_v33 }
 0x29f   :  { %260 = vperm.xlu1 %369, %v251_v34  }
 0x312   :  { %v305_v35 = vpop.permute.xlu0 %304 }
 0x313   :  { %v307_v36 = vmul.f32 %v305_v35, %v488_v40 }
 0x316   :  { %v311_v37 = vpop.permute.xlu1 %310 }
 0x317   :  { %v313_v38 = vadd.f32 %v311_v37, %v307_v36 }
 0x319   :  { %315 = vrot.lane.b32.xlu1 %v313_v38, %s409_s28 }
 0x31a   :  { %v255_v39 = vpop.permute.xlu1 %254 }
 0x31b   :  { %v257_v41 = vmul.f32 %v255_v39, %v488_v40 }
 0x31e   :  { %v261_v42 = vpop.permute.xlu1 %260 }
 0x31f   :  { %v263_v43 = vadd.f32 %v261_v42, %v257_v41 }
 0x321   :  { %264 = vst.msk [vmem:[#allocation3] sm:$0xff] %vm221_vm13, %v263_v43 }
 0x38b   :  { %v316_v44 = vpop.permute.xlu1 %315 }
 0x38c   :  { %319 = vst.msk [vmem:[#allocation3 + $0x8] sm:$0xff] %vm221_vm13, %v316_v44 }
 0x38d   :  { %388 = shalt.err (!%p385_p4)
}
 0x38e   :  { %s389_s11 = scalar_lea.hbm %s528_s4, 256 }
 0x38f   :  { %p390_p5 = scmp.ne.s32.totalorder %s528_s4, %s389_s11  ;;  %p393_p6 = scmp.lt.u32.totalorder %s389_s11, %s528_s4 }
 0x391   :  { %p395_p7 = pnand %p393_p6, %p390_p5 }
 0x393   :  { %398 = shalt.err (!%p395_p7)
}
 0x394   :  { %s412_s16 = smov 128  }
 0x395   :  { %331 = dma.vmem_to_hbm [thread:$0]  %s326_s3, 256, %s528_s4, [#allocation4], %s412_s16, %s412_s16, %s402_s20  }
 0x396   :  { %399 = dma.done.wait [#allocation4], 256  }
 0x397   :  { %400 = vsyncadd [#allocation4], 4294967040 }
 0x398   :  { %335 = vsyncpa [#allocation4], 1 }

</bundles_post_ra>
